<compile_context>
chip_gen: v5e
topology: v5e:2x2
jax: 0.10.0
libtpu: 0.0.40
codegen_flags: <defaults>
</compile_context>

<pallas_src>
import jax
import jax.numpy as jnp
from jax.experimental import pallas as pl
from jax.experimental.pallas import tpu as pltpu


def char_lstm_forward(x_idx, emb_table, w_ih, w_hh, b_ih, b_hh):
    """Reproduces CharLSTM.forward: returns h[1] == c_n of shape (1, B, H)."""
    B, T = x_idx.shape
    V, D = emb_table.shape
    H = w_hh.shape[1]
    G = 4 * H

    # Fold the time-independent input projection and both biases into the
    # embedding table (one tiny (V,D)x(D,4H) op, amortizable across calls).
    # Reshape to (V, 1, 4H) so the kernel gathers rows with a dynamic
    # leading-axis index (paged-attention-style VMEM indexing).
    proj_table = (emb_table @ w_ih.T + (b_ih + b_hh)).astype(jnp.float32)
    proj_table = proj_table.reshape(V, 1, G)

    whhT = w_hh.T.astype(jnp.float32)              # (H, 4H)
    idx = x_idx.astype(jnp.int32)                  # (B, T) -> SMEM

    def lstm_kernel(idx_ref, proj_ref, whh_ref, c_out_ref, gbuf):
        # Phase 1: in-kernel embedding gather of gate pre-activations.
        # idx_ref lives in SMEM (scalar reads), proj_ref in VMEM; each row is
        # a dynamic leading-axis load of a (1, 4H) tile, staged into gbuf.
        for t in range(T):
            rows = jnp.concatenate(
                [proj_ref[idx_ref[b, t]] for b in range(B)], axis=0)  # (B, 4H)
            gbuf[t] = rows

        # Phase 2: the serial recurrence. Only h @ W_hh^T + activations are on
        # the critical path; gbuf[t] is an aligned VMEM load with no h/c dep.
        whh = whh_ref[...]                          # (H, 4H), VMEM-resident
        h = jnp.zeros((B, H), jnp.float32)
        c = jnp.zeros((B, H), jnp.float32)

        for t in range(T):
            gates = gbuf[t] + jnp.dot(
                h, whh, preferred_element_type=jnp.float32)      # (B, 4H)

            # Two full-vreg transcendentals instead of four 32-lane ones;
            # gate order along 4H is PyTorch's (i, f, g, o).
            sig = jax.nn.sigmoid(gates)
            th = jnp.tanh(gates)
            i_g = sig[:, 0 * H:1 * H]
            f_g = sig[:, 1 * H:2 * H]
            g_g = th[:, 2 * H:3 * H]
            o_g = sig[:, 3 * H:4 * H]

            c = f_g * c + i_g * g_g
            h = o_g * jnp.tanh(c)

        c_out_ref[...] = c

    c_n = pl.pallas_call(
        lstm_kernel,
        out_shape=jax.ShapeDtypeStruct((B, H), jnp.float32),
        in_specs=[
            pl.BlockSpec(memory_space=pltpu.MemorySpace.SMEM),  # idx   (B, T)
            pl.BlockSpec(memory_space=pltpu.MemorySpace.VMEM),  # proj  (V, 1, 4H)
            pl.BlockSpec(memory_space=pltpu.MemorySpace.VMEM),  # whhT  (H, 4H)
        ],
        out_specs=pl.BlockSpec(memory_space=pltpu.MemorySpace.VMEM),
        scratch_shapes=[pltpu.VMEM((T, B, G), jnp.float32)],
    )(idx, proj_table, whhT)

    return c_n.reshape(1, B, H)


def char_lstm_reference(x_idx, emb_table, w_ih, w_hh, b_ih, b_hh):
    """Pure-JAX reference of the same forward (for correctness checking)."""
    B, _ = x_idx.shape
    H = w_hh.shape[1]
    emb = jnp.take(emb_table, x_idx, axis=0)      # (B, T, D)
    x_tm = jnp.transpose(emb, (1, 0, 2))          # (T, B, D)

    def step(carry, x_t):
        h, c = carry
        gates = x_t @ w_ih.T + h @ w_hh.T + b_ih + b_hh
        i_g = jax.nn.sigmoid(gates[:, 0 * H:1 * H])
        f_g = jax.nn.sigmoid(gates[:, 1 * H:2 * H])
        g_g = jnp.tanh(gates[:, 2 * H:3 * H])
        o_g = jax.nn.sigmoid(gates[:, 3 * H:4 * H])
        c = f_g * c + i_g * g_g
        h = o_g * jnp.tanh(c)
        return (h, c), None

    h0 = jnp.zeros((B, H), jnp.float32)
    c0 = jnp.zeros((B, H), jnp.float32)
    (_, c_n), _ = jax.lax.scan(step, (h0, c0), x_tm)
    return c_n.reshape(1, B, H)


if __name__ == "__main__":
    # Module hyper-params (small, consistent with CharLSTM.__init__).
    n_char, char_dim, char_hidden = 50, 32, 32
    batch, seq = 2, 8

    key = jax.random.PRNGKey(0)
    k_idx, k_emb, k_wih, k_whh, k_bih, k_bhh = jax.random.split(key, 6)

    # Deterministic parameter init (shapes match nn.Embedding / nn.LSTM).
    bound = 1.0 / (char_hidden ** 0.5)
    emb_table = jax.random.normal(k_emb, (n_char, char_dim), jnp.float32)
    w_ih = jax.random.uniform(k_wih, (4 * char_hidden, char_dim), jnp.float32,
                              -bound, bound)
    w_hh = jax.random.uniform(k_whh, (4 * char_hidden, char_hidden), jnp.float32,
                              -bound, bound)
    b_ih = jax.random.uniform(k_bih, (4 * char_hidden,), jnp.float32, -bound, bound)
    b_hh = jax.random.uniform(k_bhh, (4 * char_hidden,), jnp.float32, -bound, bound)

    # Input: (batch, seq) of char indices.
    x_idx = jax.random.randint(k_idx, (batch, seq), 0, n_char, jnp.int32)

    out = char_lstm_forward(x_idx, emb_table, w_ih, w_hh, b_ih, b_hh)
    out = jax.block_until_ready(out)

    ref = char_lstm_reference(x_idx, emb_table, w_ih, w_hh, b_ih, b_hh)
    assert out.shape == (1, batch, char_hidden)
    assert jnp.allclose(out, ref, atol=1e-5, rtol=1e-5)

    print("KERNEL_OK")
</pallas_src>

<mosaic_0001>
module attributes {stable_mosaic.version = 11 : i64} {
  func.func @lstm_kernel(%arg0: memref<2x8xi32, #tpu.memory_space<smem>>, %arg1: memref<50x1x128xf32, #tpu.memory_space<vmem>>, %arg2: memref<32x128xf32, #tpu.memory_space<vmem>>, %arg3: memref<2x32xf32, #tpu.memory_space<vmem>>, %arg4: memref<8x2x128xf32, #tpu.memory_space<vmem>>) attributes {dimension_semantics = [], scalar_prefetch = 0 : i64, scratch_operands = 1 : i64, tpu.core_type = #tpu.core_type<tc>} {
    %c0 = arith.constant 0 : index
    %c0_0 = arith.constant 0 : index
    %0 = memref.load %arg0[%c0, %c0_0] : memref<2x8xi32, #tpu.memory_space<smem>>
    %1 = arith.index_cast %0 : i32 to index
    %c0_1 = arith.constant 0 : index
    %c0_2 = arith.constant 0 : index
    %2 = vector.load %arg1[%1, %c0_1, %c0_2] : memref<50x1x128xf32, #tpu.memory_space<vmem>>, vector<1x1x128xf32>
    %3 = vector.shape_cast %2 : vector<1x1x128xf32> to vector<1x128xf32>
    %c1 = arith.constant 1 : index
    %c0_3 = arith.constant 0 : index
    %4 = memref.load %arg0[%c1, %c0_3] : memref<2x8xi32, #tpu.memory_space<smem>>
    %5 = arith.index_cast %4 : i32 to index
    %c0_4 = arith.constant 0 : index
    %c0_5 = arith.constant 0 : index
    %6 = vector.load %arg1[%5, %c0_4, %c0_5] : memref<50x1x128xf32, #tpu.memory_space<vmem>>, vector<1x1x128xf32>
    %7 = vector.shape_cast %6 : vector<1x1x128xf32> to vector<1x128xf32>
    %8 = tpu.concatenate %3, %7 in 0 : vector<1x128xf32>, vector<1x128xf32> -> vector<2x128xf32>
    %c0_6 = arith.constant 0 : index
    %c0_7 = arith.constant 0 : index
    %c0_8 = arith.constant 0 : index
    %9 = vector.load %arg4[%c0_6, %c0_7, %c0_8] : memref<8x2x128xf32, #tpu.memory_space<vmem>>, vector<1x2x128xf32>
    %10 = vector.shape_cast %9 : vector<1x2x128xf32> to vector<2x128xf32>
    %11 = vector.shape_cast %8 : vector<2x128xf32> to vector<1x2x128xf32>
    tpu.vector_store %arg4[%c0_6, %c0_7, %c0_8], %11 {strides = array<i32>} : memref<8x2x128xf32, #tpu.memory_space<vmem>>, vector<1x2x128xf32>,
    %c0_9 = arith.constant 0 : index
    %c1_10 = arith.constant 1 : index
    %12 = memref.load %arg0[%c0_9, %c1_10] : memref<2x8xi32, #tpu.memory_space<smem>>
    %13 = arith.index_cast %12 : i32 to index
    %c0_11 = arith.constant 0 : index
    %c0_12 = arith.constant 0 : index
    %14 = vector.load %arg1[%13, %c0_11, %c0_12] : memref<50x1x128xf32, #tpu.memory_space<vmem>>, vector<1x1x128xf32>
    %15 = vector.shape_cast %14 : vector<1x1x128xf32> to vector<1x128xf32>
    %c1_13 = arith.constant 1 : index
    %c1_14 = arith.constant 1 : index
    %16 = memref.load %arg0[%c1_13, %c1_14] : memref<2x8xi32, #tpu.memory_space<smem>>
    %17 = arith.index_cast %16 : i32 to index
    %c0_15 = arith.constant 0 : index
    %c0_16 = arith.constant 0 : index
    %18 = vector.load %arg1[%17, %c0_15, %c0_16] : memref<50x1x128xf32, #tpu.memory_space<vmem>>, vector<1x1x128xf32>
    %19 = vector.shape_cast %18 : vector<1x1x128xf32> to vector<1x128xf32>
    %20 = tpu.concatenate %15, %19 in 0 : vector<1x128xf32>, vector<1x128xf32> -> vector<2x128xf32>
    %c1_17 = arith.constant 1 : index
    %c0_18 = arith.constant 0 : index
    %c0_19 = arith.constant 0 : index
    %21 = vector.load %arg4[%c1_17, %c0_18, %c0_19] : memref<8x2x128xf32, #tpu.memory_space<vmem>>, vector<1x2x128xf32>
    %22 = vector.shape_cast %21 : vector<1x2x128xf32> to vector<2x128xf32>
    %23 = vector.shape_cast %20 : vector<2x128xf32> to vector<1x2x128xf32>
    tpu.vector_store %arg4[%c1_17, %c0_18, %c0_19], %23 {strides = array<i32>} : memref<8x2x128xf32, #tpu.memory_space<vmem>>, vector<1x2x128xf32>,
    %c0_20 = arith.constant 0 : index
    %c2 = arith.constant 2 : index
    %24 = memref.load %arg0[%c0_20, %c2] : memref<2x8xi32, #tpu.memory_space<smem>>
    %25 = arith.index_cast %24 : i32 to index
    %c0_21 = arith.constant 0 : index
    %c0_22 = arith.constant 0 : index
    %26 = vector.load %arg1[%25, %c0_21, %c0_22] : memref<50x1x128xf32, #tpu.memory_space<vmem>>, vector<1x1x128xf32>
    %27 = vector.shape_cast %26 : vector<1x1x128xf32> to vector<1x128xf32>
    %c1_23 = arith.constant 1 : index
    %c2_24 = arith.constant 2 : index
    %28 = memref.load %arg0[%c1_23, %c2_24] : memref<2x8xi32, #tpu.memory_space<smem>>
    %29 = arith.index_cast %28 : i32 to index
    %c0_25 = arith.constant 0 : index
    %c0_26 = arith.constant 0 : index
    %30 = vector.load %arg1[%29, %c0_25, %c0_26] : memref<50x1x128xf32, #tpu.memory_space<vmem>>, vector<1x1x128xf32>
    %31 = vector.shape_cast %30 : vector<1x1x128xf32> to vector<1x128xf32>
    %32 = tpu.concatenate %27, %31 in 0 : vector<1x128xf32>, vector<1x128xf32> -> vector<2x128xf32>
    %c2_27 = arith.constant 2 : index
    %c0_28 = arith.constant 0 : index
    %c0_29 = arith.constant 0 : index
    %33 = vector.load %arg4[%c2_27, %c0_28, %c0_29] : memref<8x2x128xf32, #tpu.memory_space<vmem>>, vector<1x2x128xf32>
    %34 = vector.shape_cast %33 : vector<1x2x128xf32> to vector<2x128xf32>
    %35 = vector.shape_cast %32 : vector<2x128xf32> to vector<1x2x128xf32>
    tpu.vector_store %arg4[%c2_27, %c0_28, %c0_29], %35 {strides = array<i32>} : memref<8x2x128xf32, #tpu.memory_space<vmem>>, vector<1x2x128xf32>,
    %c0_30 = arith.constant 0 : index
    %c3 = arith.constant 3 : index
    %36 = memref.load %arg0[%c0_30, %c3] : memref<2x8xi32, #tpu.memory_space<smem>>
    %37 = arith.index_cast %36 : i32 to index
    %c0_31 = arith.constant 0 : index
    %c0_32 = arith.constant 0 : index
    %38 = vector.load %arg1[%37, %c0_31, %c0_32] : memref<50x1x128xf32, #tpu.memory_space<vmem>>, vector<1x1x128xf32>
    %39 = vector.shape_cast %38 : vector<1x1x128xf32> to vector<1x128xf32>
    %c1_33 = arith.constant 1 : index
    %c3_34 = arith.constant 3 : index
    %40 = memref.load %arg0[%c1_33, %c3_34] : memref<2x8xi32, #tpu.memory_space<smem>>
    %41 = arith.index_cast %40 : i32 to index
    %c0_35 = arith.constant 0 : index
    %c0_36 = arith.constant 0 : index
    %42 = vector.load %arg1[%41, %c0_35, %c0_36] : memref<50x1x128xf32, #tpu.memory_space<vmem>>, vector<1x1x128xf32>
    %43 = vector.shape_cast %42 : vector<1x1x128xf32> to vector<1x128xf32>
    %44 = tpu.concatenate %39, %43 in 0 : vector<1x128xf32>, vector<1x128xf32> -> vector<2x128xf32>
    %c3_37 = arith.constant 3 : index
    %c0_38 = arith.constant 0 : index
    %c0_39 = arith.constant 0 : index
    %45 = vector.load %arg4[%c3_37, %c0_38, %c0_39] : memref<8x2x128xf32, #tpu.memory_space<vmem>>, vector<1x2x128xf32>
    %46 = vector.shape_cast %45 : vector<1x2x128xf32> to vector<2x128xf32>
    %47 = vector.shape_cast %44 : vector<2x128xf32> to vector<1x2x128xf32>
    tpu.vector_store %arg4[%c3_37, %c0_38, %c0_39], %47 {strides = array<i32>} : memref<8x2x128xf32, #tpu.memory_space<vmem>>, vector<1x2x128xf32>,
    %c0_40 = arith.constant 0 : index
    %c4 = arith.constant 4 : index
    %48 = memref.load %arg0[%c0_40, %c4] : memref<2x8xi32, #tpu.memory_space<smem>>
    %49 = arith.index_cast %48 : i32 to index
    %c0_41 = arith.constant 0 : index
    %c0_42 = arith.constant 0 : index
    %50 = vector.load %arg1[%49, %c0_41, %c0_42] : memref<50x1x128xf32, #tpu.memory_space<vmem>>, vector<1x1x128xf32>
    %51 = vector.shape_cast %50 : vector<1x1x128xf32> to vector<1x128xf32>
    %c1_43 = arith.constant 1 : index
    %c4_44 = arith.constant 4 : index
    %52 = memref.load %arg0[%c1_43, %c4_44] : memref<2x8xi32, #tpu.memory_space<smem>>
    %53 = arith.index_cast %52 : i32 to index
    %c0_45 = arith.constant 0 : index
    %c0_46 = arith.constant 0 : index
    %54 = vector.load %arg1[%53, %c0_45, %c0_46] : memref<50x1x128xf32, #tpu.memory_space<vmem>>, vector<1x1x128xf32>
    %55 = vector.shape_cast %54 : vector<1x1x128xf32> to vector<1x128xf32>
    %56 = tpu.concatenate %51, %55 in 0 : vector<1x128xf32>, vector<1x128xf32> -> vector<2x128xf32>
    %c4_47 = arith.constant 4 : index
    %c0_48 = arith.constant 0 : index
    %c0_49 = arith.constant 0 : index
    %57 = vector.load %arg4[%c4_47, %c0_48, %c0_49] : memref<8x2x128xf32, #tpu.memory_space<vmem>>, vector<1x2x128xf32>
    %58 = vector.shape_cast %57 : vector<1x2x128xf32> to vector<2x128xf32>
    %59 = vector.shape_cast %56 : vector<2x128xf32> to vector<1x2x128xf32>
    tpu.vector_store %arg4[%c4_47, %c0_48, %c0_49], %59 {strides = array<i32>} : memref<8x2x128xf32, #tpu.memory_space<vmem>>, vector<1x2x128xf32>,
    %c0_50 = arith.constant 0 : index
    %c5 = arith.constant 5 : index
    %60 = memref.load %arg0[%c0_50, %c5] : memref<2x8xi32, #tpu.memory_space<smem>>
    %61 = arith.index_cast %60 : i32 to index
    %c0_51 = arith.constant 0 : index
    %c0_52 = arith.constant 0 : index
    %62 = vector.load %arg1[%61, %c0_51, %c0_52] : memref<50x1x128xf32, #tpu.memory_space<vmem>>, vector<1x1x128xf32>
    %63 = vector.shape_cast %62 : vector<1x1x128xf32> to vector<1x128xf32>
    %c1_53 = arith.constant 1 : index
    %c5_54 = arith.constant 5 : index
    %64 = memref.load %arg0[%c1_53, %c5_54] : memref<2x8xi32, #tpu.memory_space<smem>>
    %65 = arith.index_cast %64 : i32 to index
    %c0_55 = arith.constant 0 : index
    %c0_56 = arith.constant 0 : index
    %66 = vector.load %arg1[%65, %c0_55, %c0_56] : memref<50x1x128xf32, #tpu.memory_space<vmem>>, vector<1x1x128xf32>
    %67 = vector.shape_cast %66 : vector<1x1x128xf32> to vector<1x128xf32>
    %68 = tpu.concatenate %63, %67 in 0 : vector<1x128xf32>, vector<1x128xf32> -> vector<2x128xf32>
    %c5_57 = arith.constant 5 : index
    %c0_58 = arith.constant 0 : index
    %c0_59 = arith.constant 0 : index
    %69 = vector.load %arg4[%c5_57, %c0_58, %c0_59] : memref<8x2x128xf32, #tpu.memory_space<vmem>>, vector<1x2x128xf32>
    %70 = vector.shape_cast %69 : vector<1x2x128xf32> to vector<2x128xf32>
    %71 = vector.shape_cast %68 : vector<2x128xf32> to vector<1x2x128xf32>
    tpu.vector_store %arg4[%c5_57, %c0_58, %c0_59], %71 {strides = array<i32>} : memref<8x2x128xf32, #tpu.memory_space<vmem>>, vector<1x2x128xf32>,
    %c0_60 = arith.constant 0 : index
    %c6 = arith.constant 6 : index
    %72 = memref.load %arg0[%c0_60, %c6] : memref<2x8xi32, #tpu.memory_space<smem>>
    %73 = arith.index_cast %72 : i32 to index
    %c0_61 = arith.constant 0 : index
    %c0_62 = arith.constant 0 : index
    %74 = vector.load %arg1[%73, %c0_61, %c0_62] : memref<50x1x128xf32, #tpu.memory_space<vmem>>, vector<1x1x128xf32>
    %75 = vector.shape_cast %74 : vector<1x1x128xf32> to vector<1x128xf32>
    %c1_63 = arith.constant 1 : index
    %c6_64 = arith.constant 6 : index
    %76 = memref.load %arg0[%c1_63, %c6_64] : memref<2x8xi32, #tpu.memory_space<smem>>
    %77 = arith.index_cast %76 : i32 to index
    %c0_65 = arith.constant 0 : index
    %c0_66 = arith.constant 0 : index
    %78 = vector.load %arg1[%77, %c0_65, %c0_66] : memref<50x1x128xf32, #tpu.memory_space<vmem>>, vector<1x1x128xf32>
    %79 = vector.shape_cast %78 : vector<1x1x128xf32> to vector<1x128xf32>
    %80 = tpu.concatenate %75, %79 in 0 : vector<1x128xf32>, vector<1x128xf32> -> vector<2x128xf32>
    %c6_67 = arith.constant 6 : index
    %c0_68 = arith.constant 0 : index
    %c0_69 = arith.constant 0 : index
    %81 = vector.load %arg4[%c6_67, %c0_68, %c0_69] : memref<8x2x128xf32, #tpu.memory_space<vmem>>, vector<1x2x128xf32>
    %82 = vector.shape_cast %81 : vector<1x2x128xf32> to vector<2x128xf32>
    %83 = vector.shape_cast %80 : vector<2x128xf32> to vector<1x2x128xf32>
    tpu.vector_store %arg4[%c6_67, %c0_68, %c0_69], %83 {strides = array<i32>} : memref<8x2x128xf32, #tpu.memory_space<vmem>>, vector<1x2x128xf32>,
    %c0_70 = arith.constant 0 : index
    %c7 = arith.constant 7 : index
    %84 = memref.load %arg0[%c0_70, %c7] : memref<2x8xi32, #tpu.memory_space<smem>>
    %85 = arith.index_cast %84 : i32 to index
    %c0_71 = arith.constant 0 : index
    %c0_72 = arith.constant 0 : index
    %86 = vector.load %arg1[%85, %c0_71, %c0_72] : memref<50x1x128xf32, #tpu.memory_space<vmem>>, vector<1x1x128xf32>
    %87 = vector.shape_cast %86 : vector<1x1x128xf32> to vector<1x128xf32>
    %c1_73 = arith.constant 1 : index
    %c7_74 = arith.constant 7 : index
    %88 = memref.load %arg0[%c1_73, %c7_74] : memref<2x8xi32, #tpu.memory_space<smem>>
    %89 = arith.index_cast %88 : i32 to index
    %c0_75 = arith.constant 0 : index
    %c0_76 = arith.constant 0 : index
    %90 = vector.load %arg1[%89, %c0_75, %c0_76] : memref<50x1x128xf32, #tpu.memory_space<vmem>>, vector<1x1x128xf32>
    %91 = vector.shape_cast %90 : vector<1x1x128xf32> to vector<1x128xf32>
    %92 = tpu.concatenate %87, %91 in 0 : vector<1x128xf32>, vector<1x128xf32> -> vector<2x128xf32>
    %c7_77 = arith.constant 7 : index
    %c0_78 = arith.constant 0 : index
    %c0_79 = arith.constant 0 : index
    %93 = vector.load %arg4[%c7_77, %c0_78, %c0_79] : memref<8x2x128xf32, #tpu.memory_space<vmem>>, vector<1x2x128xf32>
    %94 = vector.shape_cast %93 : vector<1x2x128xf32> to vector<2x128xf32>
    %95 = vector.shape_cast %92 : vector<2x128xf32> to vector<1x2x128xf32>
    tpu.vector_store %arg4[%c7_77, %c0_78, %c0_79], %95 {strides = array<i32>} : memref<8x2x128xf32, #tpu.memory_space<vmem>>, vector<1x2x128xf32>,
    %c0_80 = arith.constant 0 : index
    %c0_81 = arith.constant 0 : index
    %96 = vector.load %arg2[%c0_80, %c0_81] : memref<32x128xf32, #tpu.memory_space<vmem>>, vector<32x128xf32>
    %cst = arith.constant 0.000000e+00 : f32
    %97 = vector.broadcast %cst : f32 to vector<2x32xf32>
    %cst_82 = arith.constant 0.000000e+00 : f32
    %98 = vector.broadcast %cst_82 : f32 to vector<2x32xf32>
    %c0_83 = arith.constant 0 : index
    %c0_84 = arith.constant 0 : index
    %c0_85 = arith.constant 0 : index
    %99 = vector.load %arg4[%c0_83, %c0_84, %c0_85] : memref<8x2x128xf32, #tpu.memory_space<vmem>>, vector<1x2x128xf32>
    %100 = vector.shape_cast %99 : vector<1x2x128xf32> to vector<2x128xf32>
    %cst_86 = arith.constant dense<0.000000e+00> : vector<2x128xf32>
    %101 = tpu.matmul %97, %96, %cst_86 {dimension_numbers = #tpu.dot_dimension_numbers<[1], [0], [0], [1], [0, 0, 1, 1], [], []>} : vector<2x32xf32>, vector<32x128xf32>, vector<2x128xf32> -> vector<2x128xf32>
    %102 = arith.addf %100, %101 : vector<2x128xf32>
    %103 = arith.negf %102 : vector<2x128xf32>
    %104 = math.exp %103 : vector<2x128xf32>
    %cst_87 = arith.constant 1.000000e+00 : f32
    %105 = vector.broadcast %cst_87 : f32 to vector<2x128xf32>
    %106 = arith.addf %105, %104 : vector<2x128xf32>
    %107 = arith.divf %105, %106 : vector<2x128xf32>
    %108 = math.tanh %102 : vector<2x128xf32>
    %109 = vector.extract_strided_slice %107 {offsets = [0, 0], sizes = [2, 32], strides = [1, 1]} : vector<2x128xf32> to vector<2x32xf32>
    %110 = vector.extract_strided_slice %107 {offsets = [0, 32], sizes = [2, 32], strides = [1, 1]} : vector<2x128xf32> to vector<2x32xf32>
    %111 = vector.extract_strided_slice %108 {offsets = [0, 64], sizes = [2, 32], strides = [1, 1]} : vector<2x128xf32> to vector<2x32xf32>
    %112 = vector.extract_strided_slice %107 {offsets = [0, 96], sizes = [2, 32], strides = [1, 1]} : vector<2x128xf32> to vector<2x32xf32>
    %113 = arith.mulf %110, %98 : vector<2x32xf32>
    %114 = arith.mulf %109, %111 : vector<2x32xf32>
    %115 = arith.addf %113, %114 : vector<2x32xf32>
    %116 = math.tanh %115 : vector<2x32xf32>
    %117 = arith.mulf %112, %116 : vector<2x32xf32>
    %c1_88 = arith.constant 1 : index
    %c0_89 = arith.constant 0 : index
    %c0_90 = arith.constant 0 : index
    %118 = vector.load %arg4[%c1_88, %c0_89, %c0_90] : memref<8x2x128xf32, #tpu.memory_space<vmem>>, vector<1x2x128xf32>
    %119 = vector.shape_cast %118 : vector<1x2x128xf32> to vector<2x128xf32>
    %cst_91 = arith.constant dense<0.000000e+00> : vector<2x128xf32>
    %120 = tpu.matmul %117, %96, %cst_91 {dimension_numbers = #tpu.dot_dimension_numbers<[1], [0], [0], [1], [0, 0, 1, 1], [], []>} : vector<2x32xf32>, vector<32x128xf32>, vector<2x128xf32> -> vector<2x128xf32>
    %121 = arith.addf %119, %120 : vector<2x128xf32>
    %122 = arith.negf %121 : vector<2x128xf32>
    %123 = math.exp %122 : vector<2x128xf32>
    %cst_92 = arith.constant 1.000000e+00 : f32
    %124 = vector.broadcast %cst_92 : f32 to vector<2x128xf32>
    %125 = arith.addf %124, %123 : vector<2x128xf32>
    %126 = arith.divf %124, %125 : vector<2x128xf32>
    %127 = math.tanh %121 : vector<2x128xf32>
    %128 = vector.extract_strided_slice %126 {offsets = [0, 0], sizes = [2, 32], strides = [1, 1]} : vector<2x128xf32> to vector<2x32xf32>
    %129 = vector.extract_strided_slice %126 {offsets = [0, 32], sizes = [2, 32], strides = [1, 1]} : vector<2x128xf32> to vector<2x32xf32>
    %130 = vector.extract_strided_slice %127 {offsets = [0, 64], sizes = [2, 32], strides = [1, 1]} : vector<2x128xf32> to vector<2x32xf32>
    %131 = vector.extract_strided_slice %126 {offsets = [0, 96], sizes = [2, 32], strides = [1, 1]} : vector<2x128xf32> to vector<2x32xf32>
    %132 = arith.mulf %129, %115 : vector<2x32xf32>
    %133 = arith.mulf %128, %130 : vector<2x32xf32>
    %134 = arith.addf %132, %133 : vector<2x32xf32>
    %135 = math.tanh %134 : vector<2x32xf32>
    %136 = arith.mulf %131, %135 : vector<2x32xf32>
    %c2_93 = arith.constant 2 : index
    %c0_94 = arith.constant 0 : index
    %c0_95 = arith.constant 0 : index
    %137 = vector.load %arg4[%c2_93, %c0_94, %c0_95] : memref<8x2x128xf32, #tpu.memory_space<vmem>>, vector<1x2x128xf32>
    %138 = vector.shape_cast %137 : vector<1x2x128xf32> to vector<2x128xf32>
    %cst_96 = arith.constant dense<0.000000e+00> : vector<2x128xf32>
    %139 = tpu.matmul %136, %96, %cst_96 {dimension_numbers = #tpu.dot_dimension_numbers<[1], [0], [0], [1], [0, 0, 1, 1], [], []>} : vector<2x32xf32>, vector<32x128xf32>, vector<2x128xf32> -> vector<2x128xf32>
    %140 = arith.addf %138, %139 : vector<2x128xf32>
    %141 = arith.negf %140 : vector<2x128xf32>
    %142 = math.exp %141 : vector<2x128xf32>
    %cst_97 = arith.constant 1.000000e+00 : f32
    %143 = vector.broadcast %cst_97 : f32 to vector<2x128xf32>
    %144 = arith.addf %143, %142 : vector<2x128xf32>
    %145 = arith.divf %143, %144 : vector<2x128xf32>
    %146 = math.tanh %140 : vector<2x128xf32>
    %147 = vector.extract_strided_slice %145 {offsets = [0, 0], sizes = [2, 32], strides = [1, 1]} : vector<2x128xf32> to vector<2x32xf32>
    %148 = vector.extract_strided_slice %145 {offsets = [0, 32], sizes = [2, 32], strides = [1, 1]} : vector<2x128xf32> to vector<2x32xf32>
    %149 = vector.extract_strided_slice %146 {offsets = [0, 64], sizes = [2, 32], strides = [1, 1]} : vector<2x128xf32> to vector<2x32xf32>
    %150 = vector.extract_strided_slice %145 {offsets = [0, 96], sizes = [2, 32], strides = [1, 1]} : vector<2x128xf32> to vector<2x32xf32>
    %151 = arith.mulf %148, %134 : vector<2x32xf32>
    %152 = arith.mulf %147, %149 : vector<2x32xf32>
    %153 = arith.addf %151, %152 : vector<2x32xf32>
    %154 = math.tanh %153 : vector<2x32xf32>
    %155 = arith.mulf %150, %154 : vector<2x32xf32>
    %c3_98 = arith.constant 3 : index
    %c0_99 = arith.constant 0 : index
    %c0_100 = arith.constant 0 : index
    %156 = vector.load %arg4[%c3_98, %c0_99, %c0_100] : memref<8x2x128xf32, #tpu.memory_space<vmem>>, vector<1x2x128xf32>
    %157 = vector.shape_cast %156 : vector<1x2x128xf32> to vector<2x128xf32>
    %cst_101 = arith.constant dense<0.000000e+00> : vector<2x128xf32>
    %158 = tpu.matmul %155, %96, %cst_101 {dimension_numbers = #tpu.dot_dimension_numbers<[1], [0], [0], [1], [0, 0, 1, 1], [], []>} : vector<2x32xf32>, vector<32x128xf32>, vector<2x128xf32> -> vector<2x128xf32>
    %159 = arith.addf %157, %158 : vector<2x128xf32>
    %160 = arith.negf %159 : vector<2x128xf32>
    %161 = math.exp %160 : vector<2x128xf32>
    %cst_102 = arith.constant 1.000000e+00 : f32
    %162 = vector.broadcast %cst_102 : f32 to vector<2x128xf32>
    %163 = arith.addf %162, %161 : vector<2x128xf32>
    %164 = arith.divf %162, %163 : vector<2x128xf32>
    %165 = math.tanh %159 : vector<2x128xf32>
    %166 = vector.extract_strided_slice %164 {offsets = [0, 0], sizes = [2, 32], strides = [1, 1]} : vector<2x128xf32> to vector<2x32xf32>
    %167 = vector.extract_strided_slice %164 {offsets = [0, 32], sizes = [2, 32], strides = [1, 1]} : vector<2x128xf32> to vector<2x32xf32>
    %168 = vector.extract_strided_slice %165 {offsets = [0, 64], sizes = [2, 32], strides = [1, 1]} : vector<2x128xf32> to vector<2x32xf32>
    %169 = vector.extract_strided_slice %164 {offsets = [0, 96], sizes = [2, 32], strides = [1, 1]} : vector<2x128xf32> to vector<2x32xf32>
    %170 = arith.mulf %167, %153 : vector<2x32xf32>
    %171 = arith.mulf %166, %168 : vector<2x32xf32>
    %172 = arith.addf %170, %171 : vector<2x32xf32>
    %173 = math.tanh %172 : vector<2x32xf32>
    %174 = arith.mulf %169, %173 : vector<2x32xf32>
    %c4_103 = arith.constant 4 : index
    %c0_104 = arith.constant 0 : index
    %c0_105 = arith.constant 0 : index
    %175 = vector.load %arg4[%c4_103, %c0_104, %c0_105] : memref<8x2x128xf32, #tpu.memory_space<vmem>>, vector<1x2x128xf32>
    %176 = vector.shape_cast %175 : vector<1x2x128xf32> to vector<2x128xf32>
    %cst_106 = arith.constant dense<0.000000e+00> : vector<2x128xf32>
    %177 = tpu.matmul %174, %96, %cst_106 {dimension_numbers = #tpu.dot_dimension_numbers<[1], [0], [0], [1], [0, 0, 1, 1], [], []>} : vector<2x32xf32>, vector<32x128xf32>, vector<2x128xf32> -> vector<2x128xf32>
    %178 = arith.addf %176, %177 : vector<2x128xf32>
    %179 = arith.negf %178 : vector<2x128xf32>
    %180 = math.exp %179 : vector<2x128xf32>
    %cst_107 = arith.constant 1.000000e+00 : f32
    %181 = vector.broadcast %cst_107 : f32 to vector<2x128xf32>
    %182 = arith.addf %181, %180 : vector<2x128xf32>
    %183 = arith.divf %181, %182 : vector<2x128xf32>
    %184 = math.tanh %178 : vector<2x128xf32>
    %185 = vector.extract_strided_slice %183 {offsets = [0, 0], sizes = [2, 32], strides = [1, 1]} : vector<2x128xf32> to vector<2x32xf32>
    %186 = vector.extract_strided_slice %183 {offsets = [0, 32], sizes = [2, 32], strides = [1, 1]} : vector<2x128xf32> to vector<2x32xf32>
    %187 = vector.extract_strided_slice %184 {offsets = [0, 64], sizes = [2, 32], strides = [1, 1]} : vector<2x128xf32> to vector<2x32xf32>
    %188 = vector.extract_strided_slice %183 {offsets = [0, 96], sizes = [2, 32], strides = [1, 1]} : vector<2x128xf32> to vector<2x32xf32>
    %189 = arith.mulf %186, %172 : vector<2x32xf32>
    %190 = arith.mulf %185, %187 : vector<2x32xf32>
    %191 = arith.addf %189, %190 : vector<2x32xf32>
    %192 = math.tanh %191 : vector<2x32xf32>
    %193 = arith.mulf %188, %192 : vector<2x32xf32>
    %c5_108 = arith.constant 5 : index
    %c0_109 = arith.constant 0 : index
    %c0_110 = arith.constant 0 : index
    %194 = vector.load %arg4[%c5_108, %c0_109, %c0_110] : memref<8x2x128xf32, #tpu.memory_space<vmem>>, vector<1x2x128xf32>
    %195 = vector.shape_cast %194 : vector<1x2x128xf32> to vector<2x128xf32>
    %cst_111 = arith.constant dense<0.000000e+00> : vector<2x128xf32>
    %196 = tpu.matmul %193, %96, %cst_111 {dimension_numbers = #tpu.dot_dimension_numbers<[1], [0], [0], [1], [0, 0, 1, 1], [], []>} : vector<2x32xf32>, vector<32x128xf32>, vector<2x128xf32> -> vector<2x128xf32>
    %197 = arith.addf %195, %196 : vector<2x128xf32>
    %198 = arith.negf %197 : vector<2x128xf32>
    %199 = math.exp %198 : vector<2x128xf32>
    %cst_112 = arith.constant 1.000000e+00 : f32
    %200 = vector.broadcast %cst_112 : f32 to vector<2x128xf32>
    %201 = arith.addf %200, %199 : vector<2x128xf32>
    %202 = arith.divf %200, %201 : vector<2x128xf32>
    %203 = math.tanh %197 : vector<2x128xf32>
    %204 = vector.extract_strided_slice %202 {offsets = [0, 0], sizes = [2, 32], strides = [1, 1]} : vector<2x128xf32> to vector<2x32xf32>
    %205 = vector.extract_strided_slice %202 {offsets = [0, 32], sizes = [2, 32], strides = [1, 1]} : vector<2x128xf32> to vector<2x32xf32>
    %206 = vector.extract_strided_slice %203 {offsets = [0, 64], sizes = [2, 32], strides = [1, 1]} : vector<2x128xf32> to vector<2x32xf32>
    %207 = vector.extract_strided_slice %202 {offsets = [0, 96], sizes = [2, 32], strides = [1, 1]} : vector<2x128xf32> to vector<2x32xf32>
    %208 = arith.mulf %205, %191 : vector<2x32xf32>
    %209 = arith.mulf %204, %206 : vector<2x32xf32>
    %210 = arith.addf %208, %209 : vector<2x32xf32>
    %211 = math.tanh %210 : vector<2x32xf32>
    %212 = arith.mulf %207, %211 : vector<2x32xf32>
    %c6_113 = arith.constant 6 : index
    %c0_114 = arith.constant 0 : index
    %c0_115 = arith.constant 0 : index
    %213 = vector.load %arg4[%c6_113, %c0_114, %c0_115] : memref<8x2x128xf32, #tpu.memory_space<vmem>>, vector<1x2x128xf32>
    %214 = vector.shape_cast %213 : vector<1x2x128xf32> to vector<2x128xf32>
    %cst_116 = arith.constant dense<0.000000e+00> : vector<2x128xf32>
    %215 = tpu.matmul %212, %96, %cst_116 {dimension_numbers = #tpu.dot_dimension_numbers<[1], [0], [0], [1], [0, 0, 1, 1], [], []>} : vector<2x32xf32>, vector<32x128xf32>, vector<2x128xf32> -> vector<2x128xf32>
    %216 = arith.addf %214, %215 : vector<2x128xf32>
    %217 = arith.negf %216 : vector<2x128xf32>
    %218 = math.exp %217 : vector<2x128xf32>
    %cst_117 = arith.constant 1.000000e+00 : f32
    %219 = vector.broadcast %cst_117 : f32 to vector<2x128xf32>
    %220 = arith.addf %219, %218 : vector<2x128xf32>
    %221 = arith.divf %219, %220 : vector<2x128xf32>
    %222 = math.tanh %216 : vector<2x128xf32>
    %223 = vector.extract_strided_slice %221 {offsets = [0, 0], sizes = [2, 32], strides = [1, 1]} : vector<2x128xf32> to vector<2x32xf32>
    %224 = vector.extract_strided_slice %221 {offsets = [0, 32], sizes = [2, 32], strides = [1, 1]} : vector<2x128xf32> to vector<2x32xf32>
    %225 = vector.extract_strided_slice %222 {offsets = [0, 64], sizes = [2, 32], strides = [1, 1]} : vector<2x128xf32> to vector<2x32xf32>
    %226 = vector.extract_strided_slice %221 {offsets = [0, 96], sizes = [2, 32], strides = [1, 1]} : vector<2x128xf32> to vector<2x32xf32>
    %227 = arith.mulf %224, %210 : vector<2x32xf32>
    %228 = arith.mulf %223, %225 : vector<2x32xf32>
    %229 = arith.addf %227, %228 : vector<2x32xf32>
    %230 = math.tanh %229 : vector<2x32xf32>
    %231 = arith.mulf %226, %230 : vector<2x32xf32>
    %c7_118 = arith.constant 7 : index
    %c0_119 = arith.constant 0 : index
    %c0_120 = arith.constant 0 : index
    %232 = vector.load %arg4[%c7_118, %c0_119, %c0_120] : memref<8x2x128xf32, #tpu.memory_space<vmem>>, vector<1x2x128xf32>
    %233 = vector.shape_cast %232 : vector<1x2x128xf32> to vector<2x128xf32>
    %cst_121 = arith.constant dense<0.000000e+00> : vector<2x128xf32>
    %234 = tpu.matmul %231, %96, %cst_121 {dimension_numbers = #tpu.dot_dimension_numbers<[1], [0], [0], [1], [0, 0, 1, 1], [], []>} : vector<2x32xf32>, vector<32x128xf32>, vector<2x128xf32> -> vector<2x128xf32>
    %235 = arith.addf %233, %234 : vector<2x128xf32>
    %236 = arith.negf %235 : vector<2x128xf32>
    %237 = math.exp %236 : vector<2x128xf32>
    %cst_122 = arith.constant 1.000000e+00 : f32
    %238 = vector.broadcast %cst_122 : f32 to vector<2x128xf32>
    %239 = arith.addf %238, %237 : vector<2x128xf32>
    %240 = arith.divf %238, %239 : vector<2x128xf32>
    %241 = math.tanh %235 : vector<2x128xf32>
    %242 = vector.extract_strided_slice %240 {offsets = [0, 0], sizes = [2, 32], strides = [1, 1]} : vector<2x128xf32> to vector<2x32xf32>
    %243 = vector.extract_strided_slice %240 {offsets = [0, 32], sizes = [2, 32], strides = [1, 1]} : vector<2x128xf32> to vector<2x32xf32>
    %244 = vector.extract_strided_slice %241 {offsets = [0, 64], sizes = [2, 32], strides = [1, 1]} : vector<2x128xf32> to vector<2x32xf32>
    %245 = arith.mulf %243, %229 : vector<2x32xf32>
    %246 = arith.mulf %242, %244 : vector<2x32xf32>
    %247 = arith.addf %245, %246 : vector<2x32xf32>
    %c0_123 = arith.constant 0 : index
    %c0_124 = arith.constant 0 : index
    %248 = vector.load %arg3[%c0_123, %c0_124] : memref<2x32xf32, #tpu.memory_space<vmem>>, vector<2x32xf32>
    tpu.vector_store %arg3[%c0_123, %c0_124], %247 {strides = array<i32>} : memref<2x32xf32, #tpu.memory_space<vmem>>, vector<2x32xf32>,
    return
  }
}

</mosaic_0001>

<bundles_post_ra>
// kernel: tpu_custom_call.1
= control target key start
LH: loop header
LB: loop body
LE: loop exit
PB: predicated region body
PF: predicated region fallthrough
CT: control target
= control target key end

     0   :  { %8 = vsyncpa [#allocation6], 0  ;;  %s999_s0 = inlined_call_operand.hbm [shape: s32[2,8], index: 0, kind: input, shape index: {}]   ;;  %s1000_s1 = inlined_call_operand.hbm [shape: f32[50,1,128], index: 1, kind: input, shape index: {}]   ;;  %s1001_s2 = inlined_call_operand.hbm [shape: f32[32,128], index: 2, kind: input, shape index: {}]   ;;  %s1002_s3 = inlined_call_operand.hbm [shape: f32[2,32], index: 3, kind: output, shape index: {}]  }
   0x1   :  { %9 = vsyncpa [#allocation4], 0 }
   0x2   :  { %10 = vsyncpa [#allocation9], 0 }
   0x3   :  { %11 = vsyncpa [#allocation5], 0  ;;  %s17_s14 = sshll.u32 %s999_s0, 4  ;;  %s25_s17 = sshll.u32 %s1000_s1, 4  ;;  %s18_s14 = int_to_ptr.hbm [resolvable:$true] %s17_s14  ;;  %s26_s17 = int_to_ptr.hbm [resolvable:$true] %s25_s17 }
   0x4   :  { %s910_s18 = smov [#allocation3]   ;;  %s911_s19 = smov [#allocation7]  }
   0x5   :  { %20 = dma.hbm_to_smem %s18_s14, 32, %s910_s18, [#allocation6]  }
   0x6   :  { %s27_s20 = sshll.u32 %s911_s19, 4  ;;  %s912_s21 = smov 16   ;;  %s28_s20 = int_to_ptr.vmem [resolvable:$true] %s27_s20 }
   0x7   :  { %s913_s22 = smov 1   ;;  %s38_s25 = sshll.u32 %s1001_s2, 4  ;;  %s39_s25 = int_to_ptr.hbm [resolvable:$true] %s38_s25 }
   0x8   :  { %33 = dma.hbm_to_vmem [thread:$0]  %s26_s17, 800, %s28_s20, [#allocation4], %s912_s21, %s912_s21, %s913_s22  }
   0x9   :  { %s914_s0 = smov [#allocation8]   ;;  %s915_s27 = smov 128  }
   0xa   :  { %s40_s26 = sshll.u32 %s914_s0, 4  ;;  %s916_s28 = smov 8   ;;  %s41_s26 = int_to_ptr.vmem [resolvable:$true] %s40_s26 }
   0xb   :  { %46 = dma.hbm_to_vmem [thread:$0]  %s39_s25, 512, %s41_s26, [#allocation9], %s915_s27, %s915_s27, %s916_s28  }
   0xc   :  { %902 = dma.done.wait [#allocation6], 32  }
   0xd   :  { %903 = vsyncadd [#allocation6], 4294967264 }
   0xe   :  { %904 = dma.done.wait [#allocation4], 800  }
   0xf   :  { %905 = vsyncadd [#allocation4], 4294966496 }
  0x10   :  { %906 = dma.done.wait [#allocation9], 512  }
  0x11   :  { %907 = vsyncadd [#allocation9], 4294966784 }
  0x12   :  { %59 = sfence }
  0x13   :  { %v159_v0 = vld [vmem:[#allocation8 + $0x18] sm:$0xff]  ;;  %v158_v1 = vld [vmem:[#allocation8 + $0x10] sm:$0xff]  ;;  %s60_s1 = sld [smem:[#allocation3]]  ;;  %v157_v2 = vld [vmem:[#allocation8 + $0x8] sm:$0xff]  ;;  %vm69_vm0 = vcmask 1040384   ;;  %v917_v5 = vmov 0.0  }
  0x14   :  { %177 = vmatpush.msra.mxu0 %v159_v0  ;;  %s706_s29 = sld [smem:[#allocation3 + $0x80]]  ;;  %241 = vmatpush.msra.mxu1 %v159_v0  ;;  %v156_v3 = vld [vmem:[#allocation8] sm:$0xff]  ;;  %s918_s4 = smov 64   ;;  %vm161_vm5 = vcmask 261120  }
  0x15   :  { %305 = vmatpush.msra.mxu2 %v159_v0  ;;  %369 = vmatpush.msra.mxu3 %v159_v0  ;;  %s919_s5 = smov 32   ;;  %s708_s6 = sld [smem:[#allocation3 + $0x81]] }
  0x16   :  { %178 = vmatpush.msra.mxu0 %v158_v1  ;;  %242 = vmatpush.msra.mxu1 %v158_v1  ;;  %s707_s8 = sld [smem:[#allocation3 + $0x1]] }
  0x17   :  { %306 = vmatpush.msra.mxu2 %v158_v1  ;;  %370 = vmatpush.msra.mxu3 %v158_v1  ;;  %s710_s10 = sld [smem:[#allocation3 + $0x82]] }
  0x18   :  { %179 = vmatpush.msra.mxu0 %v157_v2  ;;  %243 = vmatpush.msra.mxu1 %v157_v2  ;;  %s709_s12 = sld [smem:[#allocation3 + $0x2]] }
  0x19   :  { %307 = vmatpush.msra.mxu2 %v157_v2  ;;  %371 = vmatpush.msra.mxu3 %v157_v2  ;;  %s61_s2 = scalar_lea.vmem [#allocation7], %s60_s1  ;;  %s712_s14 = sld [smem:[#allocation3 + $0x83]] }
  0x1a   :  { %180 = vmatpush.msra.mxu0 %v156_v3  ;;  %v62_v4 = vld [vmem:[%s61_s2] sm:$0x1]  ;;  %244 = vmatpush.msra.mxu1 %v156_v3  ;;  %s64_s30 = scalar_lea.vmem [#allocation7], %s706_s29  ;;  %s711_s16 = sld [smem:[#allocation3 + $0x3]] }
  0x1b   :  { %181 = vmatmul.f32.vlgmr.msra.gmra.mxu0 %v917_v5  ;;  %v748_v6 = vld [vmem:[%s64_s30] ss:$0 sm:$0xff]  ;;  %308 = vmatpush.msra.mxu2 %v156_v3  ;;  %s76_s7 = scalar_lea.vmem [#allocation7], %s708_s6  ;;  %s714_s18 = sld [smem:[#allocation3 + $0x84]] }
  0x1c   :  { %372 = vmatpush.msra.mxu3 %v156_v3  ;;  %433 = vmatpush.msrb.mxu0 %v159_v0  ;;  %v70_v7 = vsel %vm69_vm0, %v62_v4, %v748_v6  ;;  %s73_s9 = scalar_lea.vmem [#allocation7], %s707_s8  ;;  %v749_v34 = vld [vmem:[%s76_s7] ss:$0 sm:$0xff]  ;;  %s713_s20 = sld [smem:[#allocation3 + $0x4]] }
  0x1d   :  { %497 = vmatpush.msrb.mxu1 %v159_v0  ;;  %561 = vmatpush.msrb.mxu2 %v159_v0  ;;  %71 = vst [vmem:[#allocation2] sm:$0x3] %v70_v7  ;;  %v74_v33 = vld [vmem:[%s73_s9] sm:$0x1]  ;;  %s88_s11 = scalar_lea.vmem [#allocation7], %s710_s10  ;;  %s716_s22 = sld [smem:[#allocation3 + $0x85]] }
  0x1e   :  { %434 = vmatpush.msrb.mxu0 %v158_v1  ;;  %625 = vmatpush.msrb.mxu3 %v159_v0  ;;  %v81_v35 = vsel %vm69_vm0, %v74_v33, %v749_v34  ;;  %s85_s13 = scalar_lea.vmem [#allocation7], %s709_s12  ;;  %v750_v63 = vld [vmem:[%s88_s11] ss:$0 sm:$0xff]  ;;  %s715_s24 = sld [smem:[#allocation3 + $0x5]] }
  0x1f   :  { %498 = vmatpush.msrb.mxu1 %v158_v1  ;;  %562 = vmatpush.msrb.mxu2 %v158_v1  ;;  %83 = vst [vmem:[#allocation2 + $0x2] sm:$0x3] %v81_v35  ;;  %v86_v62 = vld [vmem:[%s85_s13] sm:$0x1]  ;;  %s100_s15 = scalar_lea.vmem [#allocation7], %s712_s14  ;;  %s718_s0 = sld [smem:[#allocation3 + $0x86]] }
  0x20   :  { %435 = vmatpush.msrb.mxu0 %v157_v2  ;;  %626 = vmatpush.msrb.mxu3 %v158_v1  ;;  %v93_v0 = vsel %vm69_vm0, %v86_v62, %v750_v63  ;;  %s97_s17 = scalar_lea.vmem [#allocation7], %s711_s16  ;;  %s717_s27 = sld [smem:[#allocation3 + $0x6]] }
  0x21   :  { %499 = vmatpush.msrb.mxu1 %v157_v2  ;;  %563 = vmatpush.msrb.mxu2 %v157_v2  ;;  %95 = vst [vmem:[#allocation2 + $0x4] sm:$0x3] %v93_v0  ;;  %s112_s19 = scalar_lea.vmem [#allocation7], %s714_s18  ;;  %s720_s1 = sld [smem:[#allocation3 + $0x87]] }
  0x22   :  { %436 = vmatpush.msrb.mxu0 %v156_v3  ;;  %627 = vmatpush.msrb.mxu3 %v157_v2  ;;  %s109_s21 = scalar_lea.vmem [#allocation7], %s713_s20  ;;  %s719_s2 = sld [smem:[#allocation3 + $0x7]] }
  0x23   :  { %500 = vmatpush.msrb.mxu1 %v156_v3  ;;  %564 = vmatpush.msrb.mxu2 %v156_v3  ;;  %s124_s23 = scalar_lea.vmem [#allocation7], %s716_s22  ;;  %s921_s6 = smov [#allocation10]  }
  0x24   :  { %628 = vmatpush.msrb.mxu3 %v156_v3  ;;  %v160_v8 = vld [vmem:[#allocation2] sm:$0x3]  ;;  %s121_s25 = scalar_lea.vmem [#allocation7], %s715_s24  ;;  %s676_s7 = sshll.u32 %s921_s6, 4  ;;  %s677_s7 = int_to_ptr.vmem [resolvable:$true] %s676_s7 }
  0x25   :  { %s136_s26 = scalar_lea.vmem [#allocation7], %s718_s0  ;;  %s678_s10 = sshll.u32 %s1002_s3, 4  ;;  %s679_s10 = int_to_ptr.hbm [resolvable:$true] %s678_s10 }
  0x26   :  { %v223_v37 = vld [vmem:[#allocation2 + $0x2] sm:$0x3]  ;;  %s133_s28 = scalar_lea.vmem [#allocation7], %s717_s27 }
  0x27   :  { %s148_s29 = scalar_lea.vmem [#allocation7], %s720_s1 }
  0x28   :  { %v287_v2 = vld [vmem:[#allocation2 + $0x4] sm:$0x3]  ;;  %s145_s30 = scalar_lea.vmem [#allocation7], %s719_s2 }
  0x98   :  { %v182_v9 = vpop.f32.mrf.mxu0 }
  0x99   :  { %v185_v10 = vadd.f32 %v182_v9, %v160_v8 }
  0x9b   :  { %756 = vtanh.f32 %v185_v10  ;;  %v721_v12 = vmul.f32 -1.442695, %v185_v10 }
  0x9d   :  { %758 = vpow2.f32 %v721_v12 }
  0xa1   :  { %v757_v11 = vpop.eup %756 }
  0xa2   :  { %208 = vrot.lane.b32.xlu0 %v757_v11, %s918_s4 }
  0xa3   :  { %v759_v13 = vpop.eup %758 }
  0xa4   :  { %v189_v14 = vadd.f32 1.0, %v759_v13 }
  0xa6   :  { %760 = vrcp.f32 %v189_v14  ;;  %v201_v20 = vand.u32 2147483648, %v189_v14  ;;  %vm195_vm2 = vweird.f32 %v189_v14  ;;  %v199_v21 = vand.u32 2147483647, %v189_v14 }
  0xa8   :  { %v202_v23 = vor.u32 1.1754944e-38, %v201_v20  ;;  %vm200_vm4 = vcmp.eq.f32.partialorder %v199_v21, 8.507059e+37 }
  0xac   :  { %v761_v15 = vpop.eup %760 }
  0xad   :  { %v191_v16 = vmul.f32 %v761_v15, %v189_v14  ;;  %vm196_vm1 = vweird.f32 %v761_v15 }
  0xae   :  { %vm197_vm3 = vmor %vm195_vm2, %vm196_vm1 }
  0xaf   :  { %v192_v17 = vsub.f32 1.0, %v191_v16 }
  0xb1   :  { %v193_v18 = vmul.f32 %v761_v15, %v192_v17 }
  0xb3   :  { %v194_v19 = vadd.f32 %v761_v15, %v193_v18 }
  0xb5   :  { %v198_v22 = vsel %vm197_vm3, %v761_v15, %v194_v19 }
  0xb6   :  { %v203_v25 = vsel %vm200_vm4, %v202_v23, %v198_v22 }
  0xb7   :  { %v206_v27 = vmul.f32 0.0, %v203_v25 }
 0x114   :  { %v209_v24 = vpop.permute.xlu0 %208 }
 0x115   :  { %v211_v26 = vmul.f32 %v209_v24, %v203_v25 }
 0x117   :  { %213 = vrot.lane.b32.xlu0 %v211_v26, %s919_s5 }
 0x189   :  { %v214_v28 = vpop.permute.xlu0 %213 }
 0x18a   :  { %v216_v29 = vadd.f32 %v214_v28, %v206_v27  ;;  %v98_v27 = vld [vmem:[%s97_s17] sm:$0x1] }
 0x18b   :  { %v751_v28 = vld [vmem:[%s100_s15] ss:$0 sm:$0xff] }
 0x18c   :  { %762 = vtanh.f32 %v216_v29 }
 0x192   :  { %v763_v30 = vpop.eup %762 }
 0x193   :  { %219 = vrot.lane.b32.xlu1 %v763_v30, %s918_s4 }
 0x205   :  { %v220_v31 = vpop.permute.xlu1 %219 }
 0x206   :  { %v222_v32 = vmul.f32 %v220_v31, %v203_v25 }
 0x208   :  { %225 = vrot.lane.b32.xlu1 %v222_v32, %s919_s5 }
 0x27a   :  { %v226_v36 = vpop.permute.xlu1 %225 }
 0x27b   :  { %722 = vmatmul.msk.f32.vlgmr.msra.gmra.mxu1 %vm161_vm5, %v226_v36 }
 0x2f8   :  { %v246_v38 = vpop.f32.mrf.mxu1 }
 0x2f9   :  { %v249_v39 = vadd.f32 %v246_v38, %v223_v37 }
 0x2fb   :  { %764 = vtanh.f32 %v249_v39  ;;  %v723_v41 = vmul.f32 -1.442695, %v249_v39 }
 0x2fd   :  { %766 = vpow2.f32 %v723_v41 }
 0x301   :  { %v765_v40 = vpop.eup %764 }
 0x302   :  { %272 = vrot.lane.b32.xlu2 %v765_v40, %s918_s4 }
 0x303   :  { %v767_v42 = vpop.eup %766 }
 0x304   :  { %v253_v43 = vadd.f32 1.0, %v767_v42 }
 0x306   :  { %768 = vrcp.f32 %v253_v43  ;;  %v265_v49 = vand.u32 2147483648, %v253_v43  ;;  %vm259_vm7 = vweird.f32 %v253_v43  ;;  %v263_v50 = vand.u32 2147483647, %v253_v43 }
 0x308   :  { %v266_v52 = vor.u32 1.1754944e-38, %v265_v49  ;;  %vm264_vm9 = vcmp.eq.f32.partialorder %v263_v50, 8.507059e+37 }
 0x30c   :  { %v769_v44 = vpop.eup %768 }
 0x30d   :  { %v255_v45 = vmul.f32 %v769_v44, %v253_v43  ;;  %vm260_vm6 = vweird.f32 %v769_v44 }
 0x30e   :  { %vm261_vm8 = vmor %vm259_vm7, %vm260_vm6 }
 0x30f   :  { %v256_v46 = vsub.f32 1.0, %v255_v45 }
 0x311   :  { %v257_v47 = vmul.f32 %v769_v44, %v256_v46 }
 0x313   :  { %v258_v48 = vadd.f32 %v769_v44, %v257_v47 }
 0x315   :  { %v262_v51 = vsel %vm261_vm8, %v769_v44, %v258_v48 }
 0x316   :  { %v267_v54 = vsel %vm264_vm9, %v266_v52, %v262_v51 }
 0x317   :  { %v270_v56 = vmul.f32 %v267_v54, %v216_v29  ;;  %v105_v29 = vsel %vm69_vm0, %v98_v27, %v751_v28 }
 0x318   :  { %107 = vst [vmem:[#allocation2 + $0x6] sm:$0x3] %v105_v29 }
 0x31f   :  { %v351_v31 = vld [vmem:[#allocation2 + $0x6] sm:$0x3] }
 0x35c   :  { %v273_v53 = vpop.permute.xlu2 %272 }
 0x35d   :  { %v275_v55 = vmul.f32 %v273_v53, %v267_v54 }
 0x35f   :  { %277 = vrot.lane.b32.xlu2 %v275_v55, %s919_s5 }
 0x3b9   :  { %v278_v57 = vpop.permute.xlu2 %277 }
 0x3ba   :  { %v280_v58 = vadd.f32 %v278_v57, %v270_v56  ;;  %v110_v56 = vld [vmem:[%s109_s21] sm:$0x1] }
 0x3bb   :  { %v752_v57 = vld [vmem:[%s112_s19] ss:$0 sm:$0xff] }
 0x3bc   :  { %770 = vtanh.f32 %v280_v58 }
 0x3c2   :  { %v771_v59 = vpop.eup %770 }
 0x3c3   :  { %283 = vrot.lane.b32.xlu0 %v771_v59, %s918_s4 }
 0x435   :  { %v284_v60 = vpop.permute.xlu0 %283 }
 0x436   :  { %v286_v61 = vmul.f32 %v284_v60, %v267_v54 }
 0x438   :  { %289 = vrot.lane.b32.xlu1 %v286_v61, %s919_s5 }
 0x4aa   :  { %v290_v1 = vpop.permute.xlu1 %289 }
 0x4ab   :  { %724 = vmatmul.msk.f32.vlgmr.msra.gmra.mxu2 %vm161_vm5, %v290_v1 }
 0x52e   :  { %v310_v3 = vpop.f32.mrf.mxu2 }
 0x52f   :  { %v313_v4 = vadd.f32 %v310_v3, %v287_v2 }
 0x531   :  { %772 = vtanh.f32 %v313_v4  ;;  %v725_v6 = vmul.f32 -1.442695, %v313_v4 }
 0x533   :  { %774 = vpow2.f32 %v725_v6 }
 0x537   :  { %v773_v5 = vpop.eup %772 }
 0x538   :  { %336 = vrot.lane.b32.xlu2 %v773_v5, %s918_s4 }
 0x539   :  { %v775_v7 = vpop.eup %774 }
 0x53a   :  { %v317_v8 = vadd.f32 1.0, %v775_v7 }
 0x53c   :  { %776 = vrcp.f32 %v317_v8  ;;  %v329_v14 = vand.u32 2147483648, %v317_v8  ;;  %vm323_vm11 = vweird.f32 %v317_v8  ;;  %v327_v15 = vand.u32 2147483647, %v317_v8 }
 0x53e   :  { %v330_v17 = vor.u32 1.1754944e-38, %v329_v14  ;;  %vm328_vm13 = vcmp.eq.f32.partialorder %v327_v15, 8.507059e+37 }
 0x542   :  { %v777_v9 = vpop.eup %776 }
 0x543   :  { %v319_v10 = vmul.f32 %v777_v9, %v317_v8  ;;  %vm324_vm10 = vweird.f32 %v777_v9 }
 0x544   :  { %vm325_vm12 = vmor %vm323_vm11, %vm324_vm10 }
 0x545   :  { %v320_v11 = vsub.f32 1.0, %v319_v10 }
 0x547   :  { %v321_v12 = vmul.f32 %v777_v9, %v320_v11 }
 0x549   :  { %v322_v13 = vadd.f32 %v777_v9, %v321_v12 }
 0x54b   :  { %v326_v16 = vsel %vm325_vm12, %v777_v9, %v322_v13 }
 0x54c   :  { %v331_v19 = vsel %vm328_vm13, %v330_v17, %v326_v16 }
 0x54d   :  { %v334_v21 = vmul.f32 %v331_v19, %v280_v58  ;;  %v117_v58 = vsel %vm69_vm0, %v110_v56, %v752_v57 }
 0x54e   :  { %119 = vst [vmem:[#allocation2 + $0x8] sm:$0x3] %v117_v58 }
 0x555   :  { %v415_v60 = vld [vmem:[#allocation2 + $0x8] sm:$0x3] }
 0x592   :  { %v337_v18 = vpop.permute.xlu2 %336 }
 0x593   :  { %v339_v20 = vmul.f32 %v337_v18, %v331_v19 }
 0x595   :  { %341 = vrot.lane.b32.xlu0 %v339_v20, %s919_s5 }
 0x607   :  { %v342_v22 = vpop.permute.xlu0 %341 }
 0x608   :  { %v344_v23 = vadd.f32 %v342_v22, %v334_v21  ;;  %v122_v21 = vld [vmem:[%s121_s25] sm:$0x1] }
 0x609   :  { %v753_v22 = vld [vmem:[%s124_s23] ss:$0 sm:$0xff] }
 0x60a   :  { %778 = vtanh.f32 %v344_v23 }
 0x610   :  { %v779_v24 = vpop.eup %778 }
 0x611   :  { %347 = vrot.lane.b32.xlu1 %v779_v24, %s918_s4 }
 0x683   :  { %v348_v25 = vpop.permute.xlu1 %347 }
 0x684   :  { %v350_v26 = vmul.f32 %v348_v25, %v331_v19 }
 0x686   :  { %353 = vrot.lane.b32.xlu2 %v350_v26, %s919_s5 }
 0x6e0   :  { %v354_v30 = vpop.permute.xlu2 %353 }
 0x6e1   :  { %726 = vmatmul.msk.f32.vlgmr.msra.gmra.mxu3 %vm161_vm5, %v354_v30 }
 0x764   :  { %v374_v32 = vpop.f32.mrf.mxu3 }
 0x765   :  { %v377_v33 = vadd.f32 %v374_v32, %v351_v31 }
 0x767   :  { %780 = vtanh.f32 %v377_v33  ;;  %v727_v35 = vmul.f32 -1.442695, %v377_v33 }
 0x769   :  { %782 = vpow2.f32 %v727_v35 }
 0x76d   :  { %v781_v34 = vpop.eup %780 }
 0x76e   :  { %400 = vrot.lane.b32.xlu0 %v781_v34, %s918_s4 }
 0x76f   :  { %v783_v36 = vpop.eup %782 }
 0x770   :  { %v381_v37 = vadd.f32 1.0, %v783_v36 }
 0x772   :  { %784 = vrcp.f32 %v381_v37  ;;  %v393_v43 = vand.u32 2147483648, %v381_v37  ;;  %vm387_vm15 = vweird.f32 %v381_v37  ;;  %v391_v44 = vand.u32 2147483647, %v381_v37 }
 0x774   :  { %v394_v46 = vor.u32 1.1754944e-38, %v393_v43  ;;  %vm392_vm2 = vcmp.eq.f32.partialorder %v391_v44, 8.507059e+37 }
 0x778   :  { %v785_v38 = vpop.eup %784 }
 0x779   :  { %v383_v39 = vmul.f32 %v785_v38, %v381_v37  ;;  %vm388_vm14 = vweird.f32 %v785_v38 }
 0x77a   :  { %vm389_vm1 = vmor %vm387_vm15, %vm388_vm14 }
 0x77b   :  { %v384_v40 = vsub.f32 1.0, %v383_v39 }
 0x77d   :  { %v385_v41 = vmul.f32 %v785_v38, %v384_v40 }
 0x77f   :  { %v386_v42 = vadd.f32 %v785_v38, %v385_v41 }
 0x781   :  { %v390_v45 = vsel %vm389_vm1, %v785_v38, %v386_v42 }
 0x782   :  { %v395_v48 = vsel %vm392_vm2, %v394_v46, %v390_v45 }
 0x783   :  { %v398_v50 = vmul.f32 %v395_v48, %v344_v23  ;;  %v129_v23 = vsel %vm69_vm0, %v122_v21, %v753_v22 }
 0x784   :  { %131 = vst [vmem:[#allocation2 + $0xa] sm:$0x3] %v129_v23 }
 0x78b   :  { %v479_v25 = vld [vmem:[#allocation2 + $0xa] sm:$0x3] }
 0x7e0   :  { %v401_v47 = vpop.permute.xlu0 %400 }
 0x7e1   :  { %v403_v49 = vmul.f32 %v401_v47, %v395_v48 }
 0x7e3   :  { %405 = vrot.lane.b32.xlu1 %v403_v49, %s919_s5 }
 0x855   :  { %v406_v51 = vpop.permute.xlu1 %405 }
 0x856   :  { %v408_v52 = vadd.f32 %v406_v51, %v398_v50  ;;  %v134_v50 = vld [vmem:[%s133_s28] sm:$0x1] }
 0x857   :  { %v754_v51 = vld [vmem:[%s136_s26] ss:$0 sm:$0xff] }
 0x858   :  { %786 = vtanh.f32 %v408_v52 }
 0x85e   :  { %v787_v53 = vpop.eup %786 }
 0x85f   :  { %411 = vrot.lane.b32.xlu2 %v787_v53, %s918_s4 }
 0x8b9   :  { %v412_v54 = vpop.permute.xlu2 %411 }
 0x8ba   :  { %v414_v55 = vmul.f32 %v412_v54, %v395_v48 }
 0x8bc   :  { %417 = vrot.lane.b32.xlu0 %v414_v55, %s919_s5 }
 0x92e   :  { %v418_v59 = vpop.permute.xlu0 %417 }
 0x92f   :  { %728 = vmatmul.msk.f32.vlgmr.msrb.gmra.mxu0 %vm161_vm5, %v418_v59 }
 0x9ac   :  { %v438_v61 = vpop.f32.mrf.mxu0 }
 0x9ad   :  { %v441_v62 = vadd.f32 %v438_v61, %v415_v60 }
 0x9af   :  { %788 = vtanh.f32 %v441_v62  ;;  %v729_v0 = vmul.f32 -1.442695, %v441_v62 }
 0x9b1   :  { %790 = vpow2.f32 %v729_v0 }
 0x9b5   :  { %v789_v63 = vpop.eup %788 }
 0x9b6   :  { %464 = vrot.lane.b32.xlu1 %v789_v63, %s918_s4 }
 0x9b7   :  { %v791_v1 = vpop.eup %790 }
 0x9b8   :  { %v445_v2 = vadd.f32 1.0, %v791_v1 }
 0x9ba   :  { %792 = vrcp.f32 %v445_v2  ;;  %v457_v8 = vand.u32 2147483648, %v445_v2  ;;  %vm451_vm4 = vweird.f32 %v445_v2  ;;  %v455_v9 = vand.u32 2147483647, %v445_v2 }
 0x9bc   :  { %v458_v11 = vor.u32 1.1754944e-38, %v457_v8  ;;  %vm456_vm7 = vcmp.eq.f32.partialorder %v455_v9, 8.507059e+37 }
 0x9c0   :  { %v793_v3 = vpop.eup %792 }
 0x9c1   :  { %v447_v4 = vmul.f32 %v793_v3, %v445_v2  ;;  %vm452_vm3 = vweird.f32 %v793_v3 }
 0x9c2   :  { %vm453_vm6 = vmor %vm451_vm4, %vm452_vm3  ;;  %vm669_vm3 = vcmask 254976  }
 0x9c3   :  { %v448_v5 = vsub.f32 1.0, %v447_v4 }
 0x9c5   :  { %v449_v6 = vmul.f32 %v793_v3, %v448_v5 }
 0x9c7   :  { %v450_v7 = vadd.f32 %v793_v3, %v449_v6 }
 0x9c9   :  { %v454_v10 = vsel %vm453_vm6, %v793_v3, %v450_v7 }
 0x9ca   :  { %v459_v13 = vsel %vm456_vm7, %v458_v11, %v454_v10 }
 0x9cb   :  { %v462_v15 = vmul.f32 %v459_v13, %v408_v52  ;;  %v141_v52 = vsel %vm69_vm0, %v134_v50, %v754_v51 }
 0x9cc   :  { %143 = vst [vmem:[#allocation2 + $0xc] sm:$0x3] %v141_v52 }
 0x9d3   :  { %v543_v54 = vld [vmem:[#allocation2 + $0xc] sm:$0x3] }
 0xa28   :  { %v465_v12 = vpop.permute.xlu1 %464 }
 0xa29   :  { %v467_v14 = vmul.f32 %v465_v12, %v459_v13 }
 0xa2b   :  { %469 = vrot.lane.b32.xlu2 %v467_v14, %s919_s5 }
 0xa85   :  { %v470_v16 = vpop.permute.xlu2 %469 }
 0xa86   :  { %v472_v17 = vadd.f32 %v470_v16, %v462_v15  ;;  %v146_v15 = vld [vmem:[%s145_s30] sm:$0x1] }
 0xa87   :  { %v755_v16 = vld [vmem:[%s148_s29] ss:$0 sm:$0xff] }
 0xa88   :  { %794 = vtanh.f32 %v472_v17 }
 0xa8e   :  { %v795_v18 = vpop.eup %794 }
 0xa8f   :  { %475 = vrot.lane.b32.xlu0 %v795_v18, %s918_s4 }
 0xb01   :  { %v476_v19 = vpop.permute.xlu0 %475 }
 0xb02   :  { %v478_v20 = vmul.f32 %v476_v19, %v459_v13 }
 0xb04   :  { %481 = vrot.lane.b32.xlu1 %v478_v20, %s919_s5 }
 0xb76   :  { %v482_v24 = vpop.permute.xlu1 %481 }
 0xb77   :  { %730 = vmatmul.msk.f32.vlgmr.msrb.gmra.mxu1 %vm161_vm5, %v482_v24 }
 0xbf4   :  { %v502_v26 = vpop.f32.mrf.mxu1 }
 0xbf5   :  { %v505_v27 = vadd.f32 %v502_v26, %v479_v25 }
 0xbf7   :  { %796 = vtanh.f32 %v505_v27  ;;  %v731_v29 = vmul.f32 -1.442695, %v505_v27 }
 0xbf9   :  { %798 = vpow2.f32 %v731_v29 }
 0xbfd   :  { %v797_v28 = vpop.eup %796 }
 0xbfe   :  { %528 = vrot.lane.b32.xlu2 %v797_v28, %s918_s4 }
 0xbff   :  { %v799_v30 = vpop.eup %798 }
 0xc00   :  { %v509_v31 = vadd.f32 1.0, %v799_v30 }
 0xc02   :  { %800 = vrcp.f32 %v509_v31  ;;  %v521_v37 = vand.u32 2147483648, %v509_v31  ;;  %vm515_vm9 = vweird.f32 %v509_v31  ;;  %v519_v38 = vand.u32 2147483647, %v509_v31 }
 0xc04   :  { %v522_v40 = vor.u32 1.1754944e-38, %v521_v37  ;;  %vm520_vm11 = vcmp.eq.f32.partialorder %v519_v38, 8.507059e+37 }
 0xc08   :  { %v801_v32 = vpop.eup %800 }
 0xc09   :  { %v511_v33 = vmul.f32 %v801_v32, %v509_v31  ;;  %vm516_vm8 = vweird.f32 %v801_v32 }
 0xc0a   :  { %vm517_vm10 = vmor %vm515_vm9, %vm516_vm8 }
 0xc0b   :  { %v512_v34 = vsub.f32 1.0, %v511_v33 }
 0xc0d   :  { %v513_v35 = vmul.f32 %v801_v32, %v512_v34 }
 0xc0f   :  { %v514_v36 = vadd.f32 %v801_v32, %v513_v35 }
 0xc11   :  { %v518_v39 = vsel %vm517_vm10, %v801_v32, %v514_v36 }
 0xc12   :  { %v523_v42 = vsel %vm520_vm11, %v522_v40, %v518_v39 }
 0xc13   :  { %v526_v44 = vmul.f32 %v523_v42, %v472_v17  ;;  %v153_v17 = vsel %vm69_vm0, %v146_v15, %v755_v16 }
 0xc14   :  { %155 = vst [vmem:[#allocation2 + $0xe] sm:$0x3] %v153_v17 }
 0xc1b   :  { %v607_v19 = vld [vmem:[#allocation2 + $0xe] sm:$0x3] }
 0xc58   :  { %v529_v41 = vpop.permute.xlu2 %528 }
 0xc59   :  { %v531_v43 = vmul.f32 %v529_v41, %v523_v42 }
 0xc5b   :  { %533 = vrot.lane.b32.xlu0 %v531_v43, %s919_s5 }
 0xccd   :  { %v534_v45 = vpop.permute.xlu0 %533 }
 0xcce   :  { %v536_v46 = vadd.f32 %v534_v45, %v526_v44 }
 0xcd0   :  { %802 = vtanh.f32 %v536_v46 }
 0xcd6   :  { %v803_v47 = vpop.eup %802 }
 0xcd7   :  { %539 = vrot.lane.b32.xlu1 %v803_v47, %s918_s4 }
 0xd49   :  { %v540_v48 = vpop.permute.xlu1 %539 }
 0xd4a   :  { %v542_v49 = vmul.f32 %v540_v48, %v523_v42 }
 0xd4c   :  { %545 = vrot.lane.b32.xlu2 %v542_v49, %s919_s5 }
 0xda6   :  { %v546_v53 = vpop.permute.xlu2 %545 }
 0xda7   :  { %732 = vmatmul.msk.f32.vlgmr.msrb.gmra.mxu2 %vm161_vm5, %v546_v53 }
 0xe2a   :  { %v566_v55 = vpop.f32.mrf.mxu2 }
 0xe2b   :  { %v569_v56 = vadd.f32 %v566_v55, %v543_v54 }
 0xe2d   :  { %804 = vtanh.f32 %v569_v56  ;;  %v733_v58 = vmul.f32 -1.442695, %v569_v56 }
 0xe2f   :  { %806 = vpow2.f32 %v733_v58 }
 0xe33   :  { %v805_v57 = vpop.eup %804 }
 0xe34   :  { %592 = vrot.lane.b32.xlu0 %v805_v57, %s918_s4 }
 0xe35   :  { %v807_v59 = vpop.eup %806 }
 0xe36   :  { %v573_v60 = vadd.f32 1.0, %v807_v59 }
 0xe38   :  { %808 = vrcp.f32 %v573_v60  ;;  %v585_v2 = vand.u32 2147483648, %v573_v60  ;;  %vm579_vm13 = vweird.f32 %v573_v60  ;;  %v583_v3 = vand.u32 2147483647, %v573_v60 }
 0xe3a   :  { %v586_v5 = vor.u32 1.1754944e-38, %v585_v2  ;;  %vm584_vm15 = vcmp.eq.f32.partialorder %v583_v3, 8.507059e+37 }
 0xe3e   :  { %v809_v61 = vpop.eup %808 }
 0xe3f   :  { %v575_v62 = vmul.f32 %v809_v61, %v573_v60  ;;  %vm580_vm12 = vweird.f32 %v809_v61 }
 0xe40   :  { %vm581_vm14 = vmor %vm579_vm13, %vm580_vm12 }
 0xe41   :  { %v576_v63 = vsub.f32 1.0, %v575_v62 }
 0xe43   :  { %v577_v0 = vmul.f32 %v809_v61, %v576_v63 }
 0xe45   :  { %v578_v1 = vadd.f32 %v809_v61, %v577_v0 }
 0xe47   :  { %v582_v4 = vsel %vm581_vm14, %v809_v61, %v578_v1 }
 0xe48   :  { %v587_v7 = vsel %vm584_vm15, %v586_v5, %v582_v4 }
 0xe49   :  { %v590_v9 = vmul.f32 %v587_v7, %v536_v46 }
 0xea6   :  { %v593_v6 = vpop.permute.xlu0 %592 }
 0xea7   :  { %v595_v8 = vmul.f32 %v593_v6, %v587_v7 }
 0xea9   :  { %597 = vrot.lane.b32.xlu1 %v595_v8, %s919_s5 }
 0xf1b   :  { %v598_v10 = vpop.permute.xlu1 %597 }
 0xf1c   :  { %v600_v11 = vadd.f32 %v598_v10, %v590_v9 }
 0xf1e   :  { %810 = vtanh.f32 %v600_v11 }
 0xf24   :  { %v811_v12 = vpop.eup %810 }
 0xf25   :  { %603 = vrot.lane.b32.xlu2 %v811_v12, %s918_s4 }
 0xf7f   :  { %v604_v13 = vpop.permute.xlu2 %603 }
 0xf80   :  { %v606_v14 = vmul.f32 %v604_v13, %v587_v7 }
 0xf82   :  { %609 = vrot.lane.b32.xlu0 %v606_v14, %s919_s5 }
 0xff4   :  { %v610_v18 = vpop.permute.xlu0 %609 }
 0xff5   :  { %734 = vmatmul.msk.f32.vlgmr.msrb.gmra.mxu3 %vm161_vm5, %v610_v18 }
0x1078   :  { %v630_v20 = vpop.f32.mrf.mxu3 }
0x1079   :  { %v633_v21 = vadd.f32 %v630_v20, %v607_v19 }
0x107b   :  { %812 = vtanh.f32 %v633_v21  ;;  %v735_v23 = vmul.f32 -1.442695, %v633_v21 }
0x107d   :  { %814 = vpow2.f32 %v735_v23 }
0x1081   :  { %v813_v22 = vpop.eup %812 }
0x1082   :  { %656 = vrot.lane.b32.xlu1 %v813_v22, %s918_s4  ;;  %s920_s4 = smov 96  }
0x1083   :  { %v815_v24 = vpop.eup %814 }
0x1084   :  { %v637_v25 = vadd.f32 1.0, %v815_v24 }
0x1086   :  { %816 = vrcp.f32 %v637_v25  ;;  %v649_v31 = vand.u32 2147483648, %v637_v25  ;;  %vm643_vm5 = vweird.f32 %v637_v25  ;;  %v647_v32 = vand.u32 2147483647, %v637_v25 }
0x1088   :  { %v650_v34 = vor.u32 1.1754944e-38, %v649_v31  ;;  %vm648_vm2 = vcmp.eq.f32.partialorder %v647_v32, 8.507059e+37 }
0x108c   :  { %v817_v26 = vpop.eup %816 }
0x108d   :  { %v639_v27 = vmul.f32 %v817_v26, %v637_v25  ;;  %vm644_vm0 = vweird.f32 %v817_v26 }
0x108e   :  { %vm645_vm1 = vmor %vm643_vm5, %vm644_vm0 }
0x108f   :  { %v640_v28 = vsub.f32 1.0, %v639_v27 }
0x1091   :  { %v641_v29 = vmul.f32 %v817_v26, %v640_v28 }
0x1093   :  { %v642_v30 = vadd.f32 %v817_v26, %v641_v29 }
0x1095   :  { %v646_v33 = vsel %vm645_vm1, %v817_v26, %v642_v30 }
0x1096   :  { %v651_v36 = vsel %vm648_vm2, %v650_v34, %v646_v33 }
0x1097   :  { %v654_v38 = vmul.f32 %v651_v36, %v600_v11 }
0x10f4   :  { %v657_v35 = vpop.permute.xlu1 %656 }
0x10f5   :  { %v659_v37 = vmul.f32 %v657_v35, %v651_v36 }
0x10f7   :  { %661 = vrot.lane.b32.xlu2 %v659_v37, %s919_s5 }
0x1151   :  { %v662_v39 = vpop.permute.xlu2 %661 }
0x1152   :  { %v664_v40 = vadd.f32 %v662_v39, %v654_v38 }
0x1154   :  { %666 = vrot.lane.b32.xlu0 %v664_v40, %s920_s4 }
0x11c6   :  { %v667_v41 = vpop.permute.xlu0 %666 }
0x11c7   :  { %670 = vst.msk [vmem:[#allocation10] sm:$0x3] %vm669_vm3, %v667_v41 }
0x11c8   :  { %681 = dma.vmem_to_hbm [thread:$0]  %s677_s7, 32, %s679_s10, [#allocation5]  }
0x11c9   :  { %908 = dma.done.wait [#allocation5], 32  }
0x11ca   :  { %909 = vsyncadd [#allocation5], 4294967264 }
0x11cb   :  { %686 = vsyncpa [#allocation4], 1 }
0x11cc   :  { %687 = vsyncpa [#allocation9], 1 }
0x11cd   :  { %688 = vsyncpa [#allocation5], 1 }
0x11ce   :  { %689 = vsyncpa [#allocation6], 1 }

</bundles_post_ra>
